<compile_context>
chip_gen: v7x
topology: tpu7x:2x2x1
jax: 0.10.0
libtpu: 0.0.40
codegen_flags: <defaults>
</compile_context>

<pallas_src>
import functools

import jax
import jax.numpy as jnp
from jax.experimental import pallas as pl
from jax.experimental.pallas import tpu as pltpu


# ---------------------------------------------------------------------------
# Kernel
# ---------------------------------------------------------------------------
def _ffm_fused_kernel(xs_ref, xc_ref, wsp_ref, wcp_ref, b1_ref, w2_ref, b2_ref,
                      o_ref, fuse_ref, sum_ref, scale_ref,
                      *, hw, tile_hw, num_tiles):
    t = pl.program_id(1)

    @pl.when(t == 0)
    def _init():
        sum_ref[...] = jnp.zeros_like(sum_ref)

    # ---- sweep 1 (t in [0, num_tiles)): conv1 + BN + ReLU on one spatial tile,
    #      keep the result resident in VMEM, accumulate channel sums for GAP.
    @pl.when(t < num_tiles)
    def _produce():
        fuse = jnp.dot(xs_ref[0], wsp_ref[...], preferred_element_type=jnp.float32)
        fuse = fuse + jnp.dot(xc_ref[0], wcp_ref[...],
                              preferred_element_type=jnp.float32)
        fuse = jnp.maximum(fuse + b1_ref[...], 0.0)        # (tile_hw, cout) f32

        if hw % tile_hw != 0:
            # zero padded rows of the last (partial) tile so the GAP sum is exact
            row = t * tile_hw + jax.lax.broadcasted_iota(jnp.int32, (tile_hw, 1), 0)
            fuse = jnp.where(row < hw, fuse, 0.0)

        sum_ref[...] += jnp.sum(fuse, axis=0, keepdims=True)
        fuse_ref[t] = fuse.astype(fuse_ref.dtype)

    # ---- attention vector, once per batch element, right after the last tile.
    @pl.when(t == num_tiles - 1)
    def _attention():
        pooled = sum_ref[...] * (1.0 / hw)                 # exact global avg pool
        att = jnp.dot(pooled, w2_ref[...].astype(jnp.float32),
                      preferred_element_type=jnp.float32)
        att = jnp.maximum(att + b2_ref[...], 0.0)
        scale_ref[...] = 1.0 + jax.nn.sigmoid(att)         # out = fuse * (1 + att)

    # ---- sweep 2 (t in [num_tiles, 2*num_tiles)): scale VMEM-resident fuse,
    #      stream result out.  No recompute, no extra HBM reads.
    @pl.when(t >= num_tiles)
    def _apply():
        tt = t - num_tiles
        o_ref[0] = (fuse_ref[tt].astype(jnp.float32)
                    * scale_ref[...]).astype(o_ref.dtype)


# ---------------------------------------------------------------------------
# Sizing helpers
# ---------------------------------------------------------------------------
def _round_up(x, m):
    return (x + m - 1) // m * m


def _vmem_budget_bytes():
    cap = 64 << 20                                   # conservative default
    try:
        cap = int(pltpu.get_tpu_info().vmem_capacity_bytes)
    except Exception:
        pass
    # ~48 MiB on 64 MiB parts (v7x), ~96 MiB on 128 MiB parts (v5e/v6e);
    # leaves headroom for compiler-internal scratch.
    return min(cap * 3 // 4, 96 << 20)


def _choose_tile_hw(hw, c_sp, c_cp, cout_p, itemsize, scratch_itemsize, budget):
    weight_bytes = 2 * ((c_sp + c_cp) * cout_p + cout_p * cout_p) * itemsize
    small_bytes = 6 * cout_p * 4 + (256 << 10)       # biases, att scratch, slack
    resident_bytes = hw * cout_p * scratch_itemsize  # VMEM-resident fuse buffer
    per_row = (2 * (c_sp + c_cp + cout_p) * itemsize  # double-buffered streams
               + cout_p * 4                           # in-kernel f32 fuse temp
               + cout_p * scratch_itemsize)           # scratch padding of last tile
    avail = budget - weight_bytes - small_bytes - resident_bytes
    if avail < 8 * per_row:
        # TODO(synk): add a streaming fallback (fuse spilled to HBM) for spatial
        # extents too large to keep the fuse buffer resident in VMEM.
        raise ValueError(
            "FeatureFusionModule kernel: resident fuse buffer (%d B) does not "
            "fit the %d B VMEM budget (HW=%d too large)." %
            (resident_bytes, budget, hw))
    t = min(hw, avail // per_row)
    if t >= hw:
        return hw
    return max(8, (int(t) // 8) * 8)


# ---------------------------------------------------------------------------
# Wrapper
# ---------------------------------------------------------------------------
def feature_fusion_module_nhwc(x_sp, x_cp, params, *, tile_hw=None):
    """x_sp: (N,H,W,C_sp), x_cp: (N,H,W,C_cp) channels-last.

    Returns (N, H, W, C_out) in x_sp.dtype.
    """
    w1_sp, w1_cp, b1, w2, b2 = params
    n, h, w, c_sp = x_sp.shape
    c_cp = x_cp.shape[-1]
    cout = w1_sp.shape[1]
    hw = h * w
    act_dtype = x_sp.dtype
    itemsize = jnp.dtype(act_dtype).itemsize

    # Lane-dense output channels: pad Cout to a multiple of 128 (masked partial
    # stores are up to ~4.5x slower); slice the padding off outside the kernel.
    cout_p = max(128, _round_up(cout, 128))
    pad = cout_p - cout

    w1_sp_p = jnp.pad(w1_sp.astype(act_dtype), ((0, 0), (0, pad)))
    w1_cp_p = jnp.pad(w1_cp.astype(act_dtype), ((0, 0), (0, pad)))
    b1_p = jnp.pad(b1.astype(jnp.float32).reshape(1, cout), ((0, 0), (0, pad)))
    w2_p = jnp.pad(w2.astype(act_dtype), ((0, pad), (0, pad)))
    b2_p = jnp.pad(b2.astype(jnp.float32).reshape(1, cout), ((0, 0), (0, pad)))

    xs = x_sp.reshape(n, hw, c_sp)
    xc = x_cp.reshape(n, hw, c_cp)

    budget = _vmem_budget_bytes()
    scratch_dtype = act_dtype                        # fuse kept resident in act dtype
    scratch_itemsize = jnp.dtype(scratch_dtype).itemsize
    if tile_hw is None:
        tile_hw = _choose_tile_hw(hw, c_sp, c_cp, cout_p, itemsize,
                                  scratch_itemsize, budget)
    else:
        tile_hw = int(tile_hw)
        tile_hw = hw if tile_hw >= hw else max(8, (tile_hw // 8) * 8)
    num_tiles = pl.cdiv(hw, tile_hw)
    last_tile = num_tiles - 1

    # xs/xc: stream tiles during sweep 1, clamp to the last tile during sweep 2
    # so no input block is re-fetched from HBM.
    xs_spec = pl.BlockSpec((1, tile_hw, c_sp),
                           lambda b, t: (b, jnp.minimum(t, last_tile), 0))
    xc_spec = pl.BlockSpec((1, tile_hw, c_cp),
                           lambda b, t: (b, jnp.minimum(t, last_tile), 0))
    wsp_spec = pl.BlockSpec((c_sp, cout_p), lambda b, t: (0, 0))
    wcp_spec = pl.BlockSpec((c_cp, cout_p), lambda b, t: (0, 0))
    w2_spec = pl.BlockSpec((cout_p, cout_p), lambda b, t: (0, 0))
    vec_spec = pl.BlockSpec((1, cout_p), lambda b, t: (0, 0))
    # Output block index parks on tile 0 through sweep 1 (never written there),
    # then advances with sweep 2; write-back only happens after correct data is
    # placed in the buffer.
    out_spec = pl.BlockSpec((1, tile_hw, cout_p),
                            lambda b, t: (b, jnp.maximum(t - num_tiles, 0), 0))

    weight_bytes = ((c_sp + c_cp) * cout_p + cout_p * cout_p) * itemsize

    out = pl.pallas_call(
        functools.partial(_ffm_fused_kernel, hw=hw, tile_hw=tile_hw,
                          num_tiles=num_tiles),
        out_shape=jax.ShapeDtypeStruct((n, hw, cout_p), act_dtype),
        grid_spec=pltpu.PrefetchScalarGridSpec(
            num_scalar_prefetch=0,
            grid=(n, 2 * num_tiles),
            in_specs=[xs_spec, xc_spec, wsp_spec, wcp_spec, vec_spec,
                      w2_spec, vec_spec],
            out_specs=out_spec,
            scratch_shapes=[
                pltpu.VMEM((num_tiles, tile_hw, cout_p), scratch_dtype),  # fuse
                pltpu.VMEM((1, cout_p), jnp.float32),                     # GAP sums
                pltpu.VMEM((1, cout_p), jnp.float32),                     # 1+sigmoid(att)
            ],
        ),
        compiler_params=pltpu.CompilerParams(
            dimension_semantics=("parallel", "arbitrary"),
            vmem_limit_bytes=int(budget),
        ),
        cost_estimate=pl.CostEstimate(
            flops=2 * n * hw * (c_sp + c_cp) * cout_p + 2 * n * cout_p * cout_p,
            transcendentals=n * cout_p,
            bytes_accessed=(n * hw * (c_sp + c_cp + cout_p) * itemsize
                            + weight_bytes + 2 * cout_p * 4),
        ),
    )(xs, xc, w1_sp_p, w1_cp_p, b1_p, w2_p, b2_p)

    if pad:
        out = out[..., :cout]
    return out.reshape(n, h, w, cout)


def feature_fusion_module(x_sp_nchw, x_cp_nchw, params, *, tile_hw=None):
    """NCHW-compatible wrapper matching the PyTorch module interface."""
    # TODO(synk): keep the surrounding model channels-last end-to-end; each of
    # these transposes is a full extra HBM pass around a memory-bound kernel.
    xs = jnp.transpose(x_sp_nchw, (0, 2, 3, 1))
    xc = jnp.transpose(x_cp_nchw, (0, 2, 3, 1))
    out = feature_fusion_module_nhwc(xs, xc, params, tile_hw=tile_hw)
    return jnp.transpose(out, (0, 3, 1, 2))


# ---------------------------------------------------------------------------
# Parameters / reference
# ---------------------------------------------------------------------------
def make_params(key, c_sp, c_cp, out_channels, eps=1e-5, dtype=jnp.bfloat16):
    """Synthetic params with eval-mode BN folded into the conv weights.

    NOTE: real checkpoints must fold their actual BN running stats; here the
    attention-branch BN assumes running_mean=0, running_var=1 for simplicity.
    """
    cin = c_sp + c_cp
    k = jax.random.split(key, 8)

    w1 = jax.random.normal(k[0], (cin, out_channels), jnp.float32) * 0.1
    g1 = 1.0 + 0.1 * jax.random.normal(k[1], (out_channels,), jnp.float32)
    be1 = 0.1 * jax.random.normal(k[2], (out_channels,), jnp.float32)
    mu1 = 0.05 * jax.random.normal(k[3], (out_channels,), jnp.float32)
    var1 = jnp.abs(1.0 + 0.1 * jax.random.normal(k[4], (out_channels,), jnp.float32))
    s1 = g1 / jnp.sqrt(var1 + eps)
    b1 = be1 - mu1 * s1
    w1 = w1 * s1[None, :]                     # fold BN scale into conv1 weight

    w2 = jax.random.normal(k[5], (out_channels, out_channels), jnp.float32) * 0.1
    g2 = 1.0 + 0.1 * jax.random.normal(k[6], (out_channels,), jnp.float32)
    be2 = 0.1 * jax.random.normal(k[7], (out_channels,), jnp.float32)
    s2 = g2 / jnp.sqrt(1.0 + eps)             # mu2 = 0, var2 = 1 (synthetic)
    b2 = be2
    w2 = w2 * s2[None, :]                     # fold BN scale into conv_atten weight

    return (w1[:c_sp].astype(dtype), w1[c_sp:].astype(dtype),
            b1.astype(jnp.float32), w2.astype(dtype), b2.astype(jnp.float32))


def reference_nhwc(x_sp, x_cp, params):
    """Pure-JAX f32 reference of the forward pass (channels-last)."""
    w1_sp, w1_cp, b1, w2, b2 = params
    xs = x_sp.astype(jnp.float32)
    xc = x_cp.astype(jnp.float32)
    fuse = (jnp.einsum("nhwc,cd->nhwd", xs, w1_sp.astype(jnp.float32))
            + jnp.einsum("nhwc,cd->nhwd", xc, w1_cp.astype(jnp.float32)))
    fuse = jnp.maximum(fuse + b1, 0.0)
    pooled = jnp.mean(fuse, axis=(1, 2), keepdims=True)
    att = jnp.einsum("nhwc,cd->nhwd", pooled, w2.astype(jnp.float32)) + b2
    att = jax.nn.sigmoid(jnp.maximum(att, 0.0))
    return fuse * att + fuse


# ---------------------------------------------------------------------------
# Demo / correctness check
# ---------------------------------------------------------------------------
if __name__ == "__main__":
    key = jax.random.PRNGKey(0)
    k_sp, k_cp, k_p, k2_sp, k2_cp, k2_p = jax.random.split(key, 6)

    # config 1: lane-dense Cout; auto tiling + forced multi-tile w/ partial tile
    N, H, W = 2, 16, 16
    C_sp, C_cp, C_out = 64, 64, 128
    x_sp = jax.random.normal(k_sp, (N, H, W, C_sp), jnp.float32).astype(jnp.bfloat16)
    x_cp = jax.random.normal(k_cp, (N, H, W, C_cp), jnp.float32).astype(jnp.bfloat16)
    params = make_params(k_p, C_sp, C_cp, C_out, dtype=jnp.bfloat16)
    ref = reference_nhwc(x_sp, x_cp, params)

    out_auto = jax.block_until_ready(feature_fusion_module_nhwc(x_sp, x_cp, params))
    assert out_auto.shape == (N, H, W, C_out)
    assert jnp.allclose(out_auto.astype(jnp.float32), ref, atol=5e-2, rtol=5e-2), \
        "NHWC (auto tile) mismatch vs reference"

    # tile_hw=96 forces several spatial tiles incl. a masked partial last tile
    out_tiled = jax.block_until_ready(
        feature_fusion_module_nhwc(x_sp, x_cp, params, tile_hw=96))
    assert jnp.allclose(out_tiled.astype(jnp.float32), ref, atol=5e-2, rtol=5e-2), \
        "NHWC (forced tile) mismatch vs reference"

    # NCHW-compatible path (PyTorch layout of the original module)
    out_nchw = jax.block_until_ready(feature_fusion_module(
        jnp.transpose(x_sp, (0, 3, 1, 2)),
        jnp.transpose(x_cp, (0, 3, 1, 2)),
        params))
    assert out_nchw.shape == (N, C_out, H, W)
    assert jnp.allclose(out_nchw.astype(jnp.float32),
                        jnp.transpose(ref, (0, 3, 1, 2)),
                        atol=5e-2, rtol=5e-2), "NCHW mismatch vs reference"

    # config 2: Cout not a multiple of 128 exercises the lane-padding path
    n2, h2, w2_, csp2, ccp2, cout2 = 1, 8, 8, 48, 32, 96
    x2_sp = jax.random.normal(k2_sp, (n2, h2, w2_, csp2), jnp.float32).astype(jnp.bfloat16)
    x2_cp = jax.random.normal(k2_cp, (n2, h2, w2_, ccp2), jnp.float32).astype(jnp.bfloat16)
    params2 = make_params(k2_p, csp2, ccp2, cout2, dtype=jnp.bfloat16)
    ref2 = reference_nhwc(x2_sp, x2_cp, params2)
    out2 = jax.block_until_ready(feature_fusion_module_nhwc(x2_sp, x2_cp, params2))
    assert out2.shape == (n2, h2, w2_, cout2)
    assert jnp.allclose(out2.astype(jnp.float32), ref2, atol=5e-2, rtol=5e-2), \
        "padded-Cout mismatch vs reference"

    print("KERNEL_OK")
</pallas_src>

<mosaic_0001>
module attributes {stable_mosaic.version = 11 : i64} {
  func.func @_ffm_fused_kernel(%arg0: i32, %arg1: i32, %arg2: memref<1x256x64xbf16, #tpu.memory_space<vmem>>, %arg3: memref<1x256x64xbf16, #tpu.memory_space<vmem>>, %arg4: memref<64x128xbf16, #tpu.memory_space<vmem>>, %arg5: memref<64x128xbf16, #tpu.memory_space<vmem>>, %arg6: memref<1x128xf32, #tpu.memory_space<vmem>>, %arg7: memref<128x128xbf16, #tpu.memory_space<vmem>>, %arg8: memref<1x128xf32, #tpu.memory_space<vmem>>, %arg9: memref<1x256x128xbf16, #tpu.memory_space<vmem>>, %arg10: memref<1x256x128xbf16, #tpu.memory_space<vmem>>, %arg11: memref<1x128xf32, #tpu.memory_space<vmem>>, %arg12: memref<1x128xf32, #tpu.memory_space<vmem>>) attributes {dimension_semantics = [#tpu.dimension_semantics<parallel>, #tpu.dimension_semantics<arbitrary>], iteration_bounds = array<i64: 2, 2>, scalar_prefetch = 0 : i64, scratch_operands = 3 : i64, tpu.core_type = #tpu.core_type<tc>, window_params = [{transform_indices = @transform_0, window_bounds = array<i64: 1, 256, 64>}, {transform_indices = @transform_1, window_bounds = array<i64: 1, 256, 64>}, {pipeline_mode = #tpu.pipeline_mode<synchronous>, transform_indices = @transform_2, window_bounds = array<i64: 64, 128>}, {pipeline_mode = #tpu.pipeline_mode<synchronous>, transform_indices = @transform_3, window_bounds = array<i64: 64, 128>}, {pipeline_mode = #tpu.pipeline_mode<synchronous>, transform_indices = @transform_4, window_bounds = array<i64: 1, 128>}, {pipeline_mode = #tpu.pipeline_mode<synchronous>, transform_indices = @transform_5, window_bounds = array<i64: 128, 128>}, {pipeline_mode = #tpu.pipeline_mode<synchronous>, transform_indices = @transform_6, window_bounds = array<i64: 1, 128>}, {transform_indices = @transform_7, window_bounds = array<i64: 1, 256, 128>}]} {
    %c0_i32 = arith.constant 0 : i32
    %0 = arith.cmpi eq, %arg1, %c0_i32 : i32
    %1 = arith.extui %0 : i1 to i32
    %c0_i32_0 = arith.constant 0 : i32
    %2 = arith.cmpi ne, %1, %c0_i32_0 : i32
    scf.if %2 {
      %cst = arith.constant 0.000000e+00 : f32
      %12 = vector.broadcast %cst : f32 to vector<1x128xf32>
      %c0 = arith.constant 0 : index
      %c0_6 = arith.constant 0 : index
      %13 = vector.load %arg11[%c0, %c0_6] : memref<1x128xf32, #tpu.memory_space<vmem>>, vector<1x128xf32>
      tpu.vector_store %arg11[%c0, %c0_6], %12 {strides = array<i32>} : memref<1x128xf32, #tpu.memory_space<vmem>>, vector<1x128xf32>,
    } else {
    }
    %c1_i32 = arith.constant 1 : i32
    %3 = arith.cmpi slt, %arg1, %c1_i32 : i32
    %4 = arith.extui %3 : i1 to i32
    %c0_i32_1 = arith.constant 0 : i32
    %5 = arith.cmpi ne, %4, %c0_i32_1 : i32
    scf.if %5 {
      %c0 = arith.constant 0 : index
      %c0_6 = arith.constant 0 : index
      %c0_7 = arith.constant 0 : index
      %12 = vector.load %arg2[%c0, %c0_6, %c0_7] : memref<1x256x64xbf16, #tpu.memory_space<vmem>>, vector<1x256x64xbf16>
      %13 = vector.shape_cast %12 : vector<1x256x64xbf16> to vector<256x64xbf16>
      %c0_8 = arith.constant 0 : index
      %c0_9 = arith.constant 0 : index
      %14 = vector.load %arg4[%c0_8, %c0_9] : memref<64x128xbf16, #tpu.memory_space<vmem>>, vector<64x128xbf16>
      %cst = arith.constant dense<0.000000e+00> : vector<256x128xf32>
      %15 = tpu.matmul %13, %14, %cst {dimension_numbers = #tpu.dot_dimension_numbers<[1], [0], [0], [1], [0, 0, 1, 1], [], []>} : vector<256x64xbf16>, vector<64x128xbf16>, vector<256x128xf32> -> vector<256x128xf32>
      %c0_10 = arith.constant 0 : index
      %c0_11 = arith.constant 0 : index
      %c0_12 = arith.constant 0 : index
      %16 = vector.load %arg3[%c0_10, %c0_11, %c0_12] : memref<1x256x64xbf16, #tpu.memory_space<vmem>>, vector<1x256x64xbf16>
      %17 = vector.shape_cast %16 : vector<1x256x64xbf16> to vector<256x64xbf16>
      %c0_13 = arith.constant 0 : index
      %c0_14 = arith.constant 0 : index
      %18 = vector.load %arg5[%c0_13, %c0_14] : memref<64x128xbf16, #tpu.memory_space<vmem>>, vector<64x128xbf16>
      %cst_15 = arith.constant dense<0.000000e+00> : vector<256x128xf32>
      %19 = tpu.matmul %17, %18, %cst_15 {dimension_numbers = #tpu.dot_dimension_numbers<[1], [0], [0], [1], [0, 0, 1, 1], [], []>} : vector<256x64xbf16>, vector<64x128xbf16>, vector<256x128xf32> -> vector<256x128xf32>
      %20 = arith.addf %15, %19 : vector<256x128xf32>
      %c0_16 = arith.constant 0 : index
      %c0_17 = arith.constant 0 : index
      %21 = vector.load %arg6[%c0_16, %c0_17] : memref<1x128xf32, #tpu.memory_space<vmem>>, vector<1x128xf32>
      %22 = vector.broadcast %21 : vector<1x128xf32> to vector<256x128xf32>
      %23 = arith.addf %20, %22 : vector<256x128xf32>
      %cst_18 = arith.constant 0.000000e+00 : f32
      %24 = vector.broadcast %cst_18 : f32 to vector<256x128xf32>
      %25 = arith.maximumf %23, %24 : vector<256x128xf32>
      %c0_19 = arith.constant 0 : index
      %c0_20 = arith.constant 0 : index
      %26 = vector.load %arg11[%c0_19, %c0_20] : memref<1x128xf32, #tpu.memory_space<vmem>>, vector<1x128xf32>
      %cst_21 = arith.constant dense<0.000000e+00> : vector<128xf32>
      %27 = vector.multi_reduction <add>, %25, %cst_21 [0] : vector<256x128xf32> to vector<128xf32>
      %28 = vector.shape_cast %27 : vector<128xf32> to vector<1x128xf32>
      %29 = arith.addf %26, %28 : vector<1x128xf32>
      %c0_22 = arith.constant 0 : index
      %c0_23 = arith.constant 0 : index
      %30 = vector.load %arg11[%c0_22, %c0_23] : memref<1x128xf32, #tpu.memory_space<vmem>>, vector<1x128xf32>
      tpu.vector_store %arg11[%c0_22, %c0_23], %29 {strides = array<i32>} : memref<1x128xf32, #tpu.memory_space<vmem>>, vector<1x128xf32>,
      %31 = arith.truncf %25 : vector<256x128xf32> to vector<256x128xbf16>
      %32 = arith.index_cast %arg1 : i32 to index
      %c0_24 = arith.constant 0 : index
      %c0_25 = arith.constant 0 : index
      %33 = vector.load %arg10[%32, %c0_24, %c0_25] : memref<1x256x128xbf16, #tpu.memory_space<vmem>>, vector<1x256x128xbf16>
      %34 = vector.shape_cast %33 : vector<1x256x128xbf16> to vector<256x128xbf16>
      %35 = vector.shape_cast %31 : vector<256x128xbf16> to vector<1x256x128xbf16>
      tpu.vector_store %arg10[%32, %c0_24, %c0_25], %35 {strides = array<i32>} : memref<1x256x128xbf16, #tpu.memory_space<vmem>>, vector<1x256x128xbf16>,
    } else {
    }
    %c0_i32_2 = arith.constant 0 : i32
    %6 = arith.cmpi eq, %arg1, %c0_i32_2 : i32
    %7 = arith.extui %6 : i1 to i32
    %c0_i32_3 = arith.constant 0 : i32
    %8 = arith.cmpi ne, %7, %c0_i32_3 : i32
    scf.if %8 {
      %c0 = arith.constant 0 : index
      %c0_6 = arith.constant 0 : index
      %12 = vector.load %arg11[%c0, %c0_6] : memref<1x128xf32, #tpu.memory_space<vmem>>, vector<1x128xf32>
      %cst = arith.constant 3.906250e-03 : f32
      %13 = vector.broadcast %cst : f32 to vector<1x128xf32>
      %14 = arith.mulf %12, %13 : vector<1x128xf32>
      %c0_7 = arith.constant 0 : index
      %c0_8 = arith.constant 0 : index
      %15 = vector.load %arg7[%c0_7, %c0_8] : memref<128x128xbf16, #tpu.memory_space<vmem>>, vector<128x128xbf16>
      %16 = arith.extf %15 : vector<128x128xbf16> to vector<128x128xf32>
      %cst_9 = arith.constant dense<0.000000e+00> : vector<1x128xf32>
      %17 = tpu.matmul %14, %16, %cst_9 {dimension_numbers = #tpu.dot_dimension_numbers<[1], [0], [0], [1], [0, 0, 1, 1], [], []>} : vector<1x128xf32>, vector<128x128xf32>, vector<1x128xf32> -> vector<1x128xf32>
      %c0_10 = arith.constant 0 : index
      %c0_11 = arith.constant 0 : index
      %18 = vector.load %arg8[%c0_10, %c0_11] : memref<1x128xf32, #tpu.memory_space<vmem>>, vector<1x128xf32>
      %19 = arith.addf %17, %18 : vector<1x128xf32>
      %cst_12 = arith.constant 0.000000e+00 : f32
      %20 = vector.broadcast %cst_12 : f32 to vector<1x128xf32>
      %21 = arith.maximumf %19, %20 : vector<1x128xf32>
      %22 = arith.negf %21 : vector<1x128xf32>
      %23 = math.exp %22 : vector<1x128xf32>
      %cst_13 = arith.constant 1.000000e+00 : f32
      %24 = vector.broadcast %cst_13 : f32 to vector<1x128xf32>
      %25 = arith.addf %24, %23 : vector<1x128xf32>
      %26 = arith.divf %24, %25 : vector<1x128xf32>
      %cst_14 = arith.constant 1.000000e+00 : f32
      %27 = vector.broadcast %cst_14 : f32 to vector<1x128xf32>
      %28 = arith.addf %27, %26 : vector<1x128xf32>
      %c0_15 = arith.constant 0 : index
      %c0_16 = arith.constant 0 : index
      %29 = vector.load %arg12[%c0_15, %c0_16] : memref<1x128xf32, #tpu.memory_space<vmem>>, vector<1x128xf32>
      tpu.vector_store %arg12[%c0_15, %c0_16], %28 {strides = array<i32>} : memref<1x128xf32, #tpu.memory_space<vmem>>, vector<1x128xf32>,
    } else {
    }
    %c1_i32_4 = arith.constant 1 : i32
    %9 = arith.cmpi sge, %arg1, %c1_i32_4 : i32
    %10 = arith.extui %9 : i1 to i32
    %c0_i32_5 = arith.constant 0 : i32
    %11 = arith.cmpi ne, %10, %c0_i32_5 : i32
    scf.if %11 {
      %c1_i32_6 = arith.constant 1 : i32
      %12 = arith.subi %arg1, %c1_i32_6 : i32
      %13 = arith.index_cast %12 : i32 to index
      %c0 = arith.constant 0 : index
      %c0_7 = arith.constant 0 : index
      %14 = vector.load %arg10[%13, %c0, %c0_7] : memref<1x256x128xbf16, #tpu.memory_space<vmem>>, vector<1x256x128xbf16>
      %15 = vector.shape_cast %14 : vector<1x256x128xbf16> to vector<256x128xbf16>
      %16 = arith.extf %15 : vector<256x128xbf16> to vector<256x128xf32>
      %c0_8 = arith.constant 0 : index
      %c0_9 = arith.constant 0 : index
      %17 = vector.load %arg12[%c0_8, %c0_9] : memref<1x128xf32, #tpu.memory_space<vmem>>, vector<1x128xf32>
      %18 = vector.broadcast %17 : vector<1x128xf32> to vector<256x128xf32>
      %19 = arith.mulf %16, %18 : vector<256x128xf32>
      %20 = arith.truncf %19 : vector<256x128xf32> to vector<256x128xbf16>
      %c0_10 = arith.constant 0 : index
      %c0_11 = arith.constant 0 : index
      %c0_12 = arith.constant 0 : index
      %21 = vector.load %arg9[%c0_10, %c0_11, %c0_12] : memref<1x256x128xbf16, #tpu.memory_space<vmem>>, vector<1x256x128xbf16>
      %22 = vector.shape_cast %21 : vector<1x256x128xbf16> to vector<256x128xbf16>
      %23 = vector.shape_cast %20 : vector<256x128xbf16> to vector<1x256x128xbf16>
      tpu.vector_store %arg9[%c0_10, %c0_11, %c0_12], %23 {strides = array<i32>} : memref<1x256x128xbf16, #tpu.memory_space<vmem>>, vector<1x256x128xbf16>,
    } else {
    }
    return
  }
  func.func @transform_0(%arg0: i32, %arg1: i32) -> (i32, i32, i32) {
    %c0_i32 = arith.constant 0 : i32
    %0 = arith.minsi %arg1, %c0_i32 : i32
    %c0_i32_0 = arith.constant 0 : i32
    %c0_i32_1 = arith.constant 0 : i32
    return %arg0, %0, %c0_i32_0 : i32, i32, i32
  }
  func.func @transform_1(%arg0: i32, %arg1: i32) -> (i32, i32, i32) {
    %c0_i32 = arith.constant 0 : i32
    %0 = arith.minsi %arg1, %c0_i32 : i32
    %c0_i32_0 = arith.constant 0 : i32
    %c0_i32_1 = arith.constant 0 : i32
    return %arg0, %0, %c0_i32_0 : i32, i32, i32
  }
  func.func @transform_2(%arg0: i32, %arg1: i32) -> (i32, i32) {
    %c0_i32 = arith.constant 0 : i32
    %c0_i32_0 = arith.constant 0 : i32
    %c0_i32_1 = arith.constant 0 : i32
    return %c0_i32, %c0_i32_0 : i32, i32
  }
  func.func @transform_3(%arg0: i32, %arg1: i32) -> (i32, i32) {
    %c0_i32 = arith.constant 0 : i32
    %c0_i32_0 = arith.constant 0 : i32
    %c0_i32_1 = arith.constant 0 : i32
    return %c0_i32, %c0_i32_0 : i32, i32
  }
  func.func @transform_4(%arg0: i32, %arg1: i32) -> (i32, i32) {
    %c0_i32 = arith.constant 0 : i32
    %c0_i32_0 = arith.constant 0 : i32
    %c0_i32_1 = arith.constant 0 : i32
    return %c0_i32, %c0_i32_0 : i32, i32
  }
  func.func @transform_5(%arg0: i32, %arg1: i32) -> (i32, i32) {
    %c0_i32 = arith.constant 0 : i32
    %c0_i32_0 = arith.constant 0 : i32
    %c0_i32_1 = arith.constant 0 : i32
    return %c0_i32, %c0_i32_0 : i32, i32
  }
  func.func @transform_6(%arg0: i32, %arg1: i32) -> (i32, i32) {
    %c0_i32 = arith.constant 0 : i32
    %c0_i32_0 = arith.constant 0 : i32
    %c0_i32_1 = arith.constant 0 : i32
    return %c0_i32, %c0_i32_0 : i32, i32
  }
  func.func @transform_7(%arg0: i32, %arg1: i32) -> (i32, i32, i32) {
    %c1_i32 = arith.constant 1 : i32
    %0 = arith.subi %arg1, %c1_i32 : i32
    %c0_i32 = arith.constant 0 : i32
    %1 = arith.maxsi %0, %c0_i32 : i32
    %c0_i32_0 = arith.constant 0 : i32
    %c0_i32_1 = arith.constant 0 : i32
    return %arg0, %1, %c0_i32_0 : i32, i32, i32
  }
}

</mosaic_0001>

<bundles_post_ra>
// kernel: tpu_custom_call.1
= control target key start
LH: loop header
LB: loop body
LE: loop exit
PB: predicated region body
PF: predicated region fallthrough
CT: control target
= control target key end

     0   :  { %12 = vsyncpa [#allocation6], 0  ;;  %s2935_s0 = inlined_call_operand.vmem [shape: bf16[2,256,64], index: 0, kind: input, shape index: {}]   ;;  %s2936_s1 = inlined_call_operand.vmem [shape: bf16[2,256,64], index: 1, kind: input, shape index: {}]   ;;  %s2937_s2 = inlined_call_operand.vmem [shape: bf16[64,128], index: 2, kind: input, shape index: {}]   ;;  %s2938_s3 = inlined_call_operand.vmem [shape: bf16[64,128], index: 3, kind: input, shape index: {}]   ;;  %s2939_s4 = inlined_call_operand.vmem [shape: f32[1,128], index: 4, kind: input, shape index: {}]   ;;  %s2940_s5 = inlined_call_operand.vmem [shape: bf16[128,128], index: 5, kind: input, shape index: {}]   ;;  %s2941_s6 = inlined_call_operand.vmem [shape: f32[1,128], index: 6, kind: input, shape index: {}]   ;;  %s2942_s7 = inlined_call_operand.hbm [shape: bf16[2,256,128], index: 7, kind: output, shape index: {}]  }
   0x1   :  { %14 = vsyncpa [#allocation6 + $0x1], 0  ;;  %s2536_s24 = smov 0   ;;  %s2538_s25 = smov 0  }
   0x2   :  { %s2540_s26 = smov 0   ;;  %s2542_s27 = smov 0  }
   0x3   :  { %s2544_s28 = smov 0   ;;  %s2546_s29 = smov 0  }
   0x4   :  { %s2548_s30 = smov 0   ;;  %s2550_s8 = smov 0  }
   0x5 LB: > { %2947 = sst [smem:[#allocation8_spill]] %s2479_s29  ;;  %s1739_s9 = sadd.s32 4294967295, %s2487_s8   ;;  %s2487_s8 = sphi %s2550_s8, %s20_s8   ;;  %s2483_s30 = sphi %s2548_s30, %s2957_s30   ;;  %s2479_s29 = sphi %s2546_s29, %s2956_s29   ;;  %s2475_s28 = sphi %s2544_s28, %s2955_s28   ;;  %s2471_s27 = sphi %s2542_s27, %s2954_s27   ;;  %s2467_s26 = sphi %s2540_s26, %s2960_s26   ;;  %s2463_s25 = sphi %s2538_s25, %s2959_s25   ;;  %s2459_s24 = sphi %s2536_s24, %s2958_s24  }
   0x6   : > { %2948 = sst [smem:[#allocation9_spill]] %s2483_s30  ;;  %s1740_s10 = sadd.s32 4294967294, %s2487_s8  }
   0x7   : > { %s29_s11 = sadd.s32 1, %s2479_s29  ;;  %s32_s12 = sadd.s32 1, %s2483_s30 }
   0x8   : > { %p30_p0 = scmp.ge.s32.totalorder %s29_s11, 2  ;;  %s216_s13 = sadd.s32 1, %s2467_s26 }
   0x9   : > { %p226_p2 = scmp.ne.s32.totalorder %s2467_s26, %s2463_s25  ;;  %p227_p3 = scmp.eq.s32.totalorder %s1739_s9, 3 }
   0xa   : > { %s2962_s11 = smov (%p30_p0, %s29_s11), 0  ;;  %s2964_s12 = smov (!%p30_p0, %s32_s12), %s2483_s30 }
   0xb   : > { %2949 = sst [smem:[#allocation10_spill]] %s2962_s11  ;;  %p34_p1 = scmp.ge.s32.totalorder %s2964_s12, 2 }
   0xc   : > { %p232_p4 = scmp.ne.s32.totalorder %s2463_s25, %s2459_s24  ;;  %p2592_p5 = por %p227_p3, %p226_p2 }
   0xd   : > { %s2966_s12 = smov (%p34_p1, %s2964_s12), 0  ;;  %p233_p7 = scmp.eq.s32.totalorder %s1740_s10, 3 }
   0xe   : > { %2950 = sst [smem:[#allocation11_spill]] %s2966_s12  ;;  %s211_s14 = ssub.s32 %s2483_s30, %s2966_s12 }
   0xf   : > { %p214_p6 = scmp.eq.s32.totalorder %s211_s14, 0  ;;  %p1745_p8 = scmp.ge.s32.totalorder %s2487_s8, 1 }
  0x10   : > { %p300_p9 = scmp.lt.s32.totalorder %s2487_s8, 5  ;;  %p2601_p10 = por %p233_p7, %p232_p4 }
  0x11   : > { %s2599_s16 = scalar_select %p214_p6, %s2467_s26, %s216_s13  }
  0x12   : > { %p301_p11 = pnand %p1745_p8, %p300_p9 }
  0x13   : > { %s2946_s18 = sand.u32 (!%p301_p11), 1, %s2463_s25   ;;  %p349_p12 = scmp.lt.s32.totalorder (!%p301_p11), %s2471_s27, 0 }
  0x14   : > { %304 = sbr.rel (%p301_p11) target bundleno = 689 (0x2b1), region = 48  ;;  %s1746_s19 = sshll.u32 (!%p301_p11), %s2946_s18, 7 }
  0x15   : > { %p352_p13 = scmp.lt.s32.totalorder (!%p301_p11), %s2475_s28, 1  ;;  %s2622_s18 = scalar_lea.vmem (!%p301_p11), [#allocation5], %s1746_s19 }
  0x16   : > { %p1753_p1 = scmp.ne.s32.totalorder (!%p301_p11), %s2471_s27, 0 }
  0x1b   : > { %s350_s20 = scalar_select %p349_p12, %s2471_s27, 0 }
  0x1c   : > { %s353_s21 = scalar_select %p352_p13, %s2475_s28, 1 }
  0x1d   : > { %s1747_s22 = sshll.u32 %s350_s20, 5  ;;  %385 = sbr.rel (%p1753_p1) target bundleno = 36 (0x24), region = 52  ;;  %v2489_v0 = vmov (!%p1753_p1), 0.0  }
  0x1e   : > { %p354_p0 = scmp.lt.s32.totalorder %s1747_s22, 31  ;;  %s1748_s23 = sshll.u32 %s353_s21, 5  ;;  %386 = vst [vmem:[#allocation3] sm:$0x1] (!%p1753_p1), %v2489_v0 }
  0x20   : > { %s2968_s22 = smov (!%p354_p0, %s1747_s22), 31 }
  0x21   : > { %s357_s9 = sadd.s32 %s1748_s23, %s2968_s22 }
  0x22   : > { %s1749_s10 = sshll.u32 %s357_s9, 2 }
  0x23   : > { %s2615_s12 = scalar_lea.vmem %s2935_s0, %s1749_s10  ;;  %s2620_s29 = scalar_lea.vmem %s2936_s1, %s1749_s10 }
  0x24 PF: > { %p1754_p2 = scmp.ge.s32.totalorder %s2471_s27, 1 }
  0x25   : > { %v2349_v1 = vld [vmem:[%s2938_s3] sm:$0xff] (!%p1754_p2)   ;;  %v2351_v3 = vld [vmem:[%s2938_s3 + $0x8] sm:$0xff] (!%p1754_p2)   ;;  %v2353_v5 = vld [vmem:[%s2938_s3 + $0x10] sm:$0xff] (!%p1754_p2)   ;;  %vm575_vm0 = vcmask (!%p1754_p2), 523264  }
  0x26   : > { %390 = sbr.rel (%p1754_p2) target bundleno = 353 (0x161), region = 56  ;;  %v2350_v2 = vld [vmem:[%s2937_s2] sm:$0xff] (!%p1754_p2)   ;;  %2101 = vmatprep.subr.bf16.mxu1 (!%p1754_p2), %v2349_v1  ;;  %v2352_v4 = vld [vmem:[%s2937_s2 + $0x8] sm:$0xff] (!%p1754_p2)   ;;  %v2354_v6 = vld [vmem:[%s2937_s2 + $0x10] sm:$0xff] (!%p1754_p2)  }
  0x27   : > { %2141 = vmatprep.subr.bf16.mxu0 (!%p1754_p2), %v2350_v2  ;;  %2102 = vmatpush3.bf16.msra.mxu1 (!%p1754_p2), %v2349_v1  ;;  %v2355_v7 = vld [vmem:[%s2938_s3 + $0x18] sm:$0xff] (!%p1754_p2)   ;;  %v2357_v9 = vld [vmem:[%s2620_s29] sm:$0xff] (!%p1754_p2)   ;;  %v2359_v11 = vld [vmem:[%s2620_s29 + $0x8] sm:$0xff] (!%p1754_p2)  }
  0x28   : > { %2142 = vmatpush3.bf16.msra.mxu0 (!%p1754_p2), %v2350_v2  ;;  %2103 = vmatprep.subr.bf16.mxu1 (!%p1754_p2), %v2351_v3  ;;  %v2356_v8 = vld [vmem:[%s2937_s2 + $0x18] sm:$0xff] (!%p1754_p2)   ;;  %v2358_v10 = vld [vmem:[%s2615_s12] sm:$0xff] (!%p1754_p2)   ;;  %v2360_v12 = vld [vmem:[%s2615_s12 + $0x8] sm:$0xff] (!%p1754_p2)  }
  0x29   : > { %2143 = vmatprep.subr.bf16.mxu0 (!%p1754_p2), %v2352_v4  ;;  %2109 = vmatprep.mubr.msk.bf16.mxu1 (!%p1754_p2), %vm575_vm0, %v2357_v9  ;;  %v2361_v13 = vld [vmem:[%s2620_s29 + $0x10] sm:$0xff] (!%p1754_p2)   ;;  %v2363_v15 = vld [vmem:[%s2620_s29 + $0x18] sm:$0xff] (!%p1754_p2)   ;;  %v2365_v17 = vld [vmem:[%s2620_s29 + $0x20] sm:$0xff] (!%p1754_p2)  }
  0x2a   : > { %2149 = vmatprep.mubr.msk.bf16.mxu0 (!%p1754_p2), %vm575_vm0, %v2358_v10  ;;  %v2362_v14 = vld [vmem:[%s2615_s12 + $0x10] sm:$0xff] (!%p1754_p2)   ;;  %v2364_v16 = vld [vmem:[%s2615_s12 + $0x18] sm:$0xff] (!%p1754_p2)   ;;  %v2366_v18 = vld [vmem:[%s2615_s12 + $0x20] sm:$0xff] (!%p1754_p2)  }
  0x2b   : > { %2104 = vmatpush3.bf16.msra.mxu1 (!%p1754_p2), %v2351_v3  ;;  %v2367_v19 = vld [vmem:[%s2620_s29 + $0x28] sm:$0xff] (!%p1754_p2)   ;;  %v2369_v21 = vld [vmem:[%s2620_s29 + $0x30] sm:$0xff] (!%p1754_p2)   ;;  %v2371_v23 = vld [vmem:[%s2620_s29 + $0x38] sm:$0xff] (!%p1754_p2)  }
  0x2c   : > { %2144 = vmatpush3.bf16.msra.mxu0 (!%p1754_p2), %v2352_v4  ;;  %2105 = vmatprep.subr.bf16.mxu1 (!%p1754_p2), %v2353_v5  ;;  %v2368_v20 = vld [vmem:[%s2615_s12 + $0x28] sm:$0xff] (!%p1754_p2)   ;;  %v2370_v22 = vld [vmem:[%s2615_s12 + $0x30] sm:$0xff] (!%p1754_p2)   ;;  %v2372_v24 = vld [vmem:[%s2615_s12 + $0x38] sm:$0xff] (!%p1754_p2)  }
  0x2d   : > { %2145 = vmatprep.subr.bf16.mxu0 %v2354_v6  ;;  %v2373_v25 = vld [vmem:[%s2620_s29 + $0x40] sm:$0xff]   ;;  %v2375_v27 = vld [vmem:[%s2620_s29 + $0x48] sm:$0xff]   ;;  %v2377_v29 = vld [vmem:[%s2620_s29 + $0x50] sm:$0xff]  }
  0x2e   : > { %v2374_v26 = vld [vmem:[%s2615_s12 + $0x40] sm:$0xff]   ;;  %v2376_v28 = vld [vmem:[%s2615_s12 + $0x48] sm:$0xff]   ;;  %v2378_v30 = vld [vmem:[%s2615_s12 + $0x50] sm:$0xff]  }
  0x2f   : > { %2106 = vmatpush3.bf16.msra.mxu1 %v2353_v5  ;;  %v2379_v31 = vld [vmem:[%s2620_s29 + $0x58] sm:$0xff]   ;;  %v2381_v33 = vld [vmem:[%s2620_s29 + $0x60] sm:$0xff]   ;;  %v2383_v35 = vld [vmem:[%s2620_s29 + $0x68] sm:$0xff]  }
  0x30   : > { %2146 = vmatpush3.bf16.msra.mxu0 %v2354_v6  ;;  %2107 = vmatprep.subr.bf16.mxu1 %v2355_v7  ;;  %v2380_v32 = vld [vmem:[%s2615_s12 + $0x58] sm:$0xff]   ;;  %v2382_v34 = vld [vmem:[%s2615_s12 + $0x60] sm:$0xff]   ;;  %v2384_v36 = vld [vmem:[%s2615_s12 + $0x68] sm:$0xff]  }
  0x31   : > { %2147 = vmatprep.subr.bf16.mxu0 %v2356_v8  ;;  %v2385_v37 = vld [vmem:[%s2620_s29 + $0x70] sm:$0xff]   ;;  %v2387_v39 = vld [vmem:[%s2620_s29 + $0x78] sm:$0xff]   ;;  %v2719_v43 = vld [vmem:[%s2939_s4] ss:$0 sm:$0xff]  ;;  %s1876_s29 = sshll.u32 %s2471_s27, 7 }
  0x32   : > { %v2386_v38 = vld [vmem:[%s2615_s12 + $0x70] sm:$0xff]   ;;  %v2388_v40 = vld [vmem:[%s2615_s12 + $0x78] sm:$0xff]   ;;  %s2726_s12 = scalar_lea.vmem [#allocation2], %s1876_s29 }
  0x33   : > { %2108 = vmatpush3.bf16.msra.mxu1 %v2355_v7 }
  0x34   : > { %2148 = vmatpush3.bf16.msra.mxu0 %v2356_v8 }
  0x36   : > { %2110 = vmatmul.mubr.msk.bf16.vlgmr.msra.gmra.mrb[0].mxu1 %vm575_vm0, %v2359_v11 }
  0x37   : > { %2150 = vmatmul.mubr.msk.bf16.vlgmr.msra.gmra.mrb[0].mxu0 %vm575_vm0, %v2360_v12  ;;  %2113 = vmatprep.mubr.msk.bf16.mxu1 %vm575_vm0, %v2361_v13 }
  0x38   : > { %2153 = vmatprep.mubr.msk.bf16.mxu0 %vm575_vm0, %v2362_v14 }
  0x3e   : > { %2114 = vmatmul.mubr.msk.bf16.gmra.mrb[4].mxu1 %vm575_vm0, %v2363_v15 }
  0x3f   : > { %2154 = vmatmul.mubr.msk.bf16.gmra.mrb[4].mxu0 %vm575_vm0, %v2364_v16  ;;  %2117 = vmatprep.mubr.msk.bf16.mxu1 %vm575_vm0, %v2365_v17 }
  0x40   : > { %2157 = vmatprep.mubr.msk.bf16.mxu0 %vm575_vm0, %v2366_v18 }
  0x46   : > { %2118 = vmatmul.mubr.msk.bf16.gmra.mrb[8].mxu1 %vm575_vm0, %v2367_v19 }
  0x47   : > { %2158 = vmatmul.mubr.msk.bf16.gmra.mrb[8].mxu0 %vm575_vm0, %v2368_v20  ;;  %2121 = vmatprep.mubr.msk.bf16.mxu1 %vm575_vm0, %v2369_v21 }
  0x48   : > { %2161 = vmatprep.mubr.msk.bf16.mxu0 %vm575_vm0, %v2370_v22 }
  0x4e   : > { %2122 = vmatmul.mubr.msk.bf16.gmra.mrb[12].mxu1 %vm575_vm0, %v2371_v23 }
  0x4f   : > { %2162 = vmatmul.mubr.msk.bf16.gmra.mrb[12].mxu0 %vm575_vm0, %v2372_v24  ;;  %2125 = vmatprep.mubr.msk.bf16.mxu1 %vm575_vm0, %v2373_v25 }
  0x50   : > { %2165 = vmatprep.mubr.msk.bf16.mxu0 %vm575_vm0, %v2374_v26 }
  0x56   : > { %2126 = vmatmul.mubr.msk.bf16.gmra.mrb[16].mxu1 %vm575_vm0, %v2375_v27 }
  0x57   : > { %2166 = vmatmul.mubr.msk.bf16.gmra.mrb[16].mxu0 %vm575_vm0, %v2376_v28  ;;  %2129 = vmatprep.mubr.msk.bf16.mxu1 %vm575_vm0, %v2377_v29 }
  0x58   : > { %2169 = vmatprep.mubr.msk.bf16.mxu0 %vm575_vm0, %v2378_v30 }
  0x5e   : > { %2130 = vmatmul.mubr.msk.bf16.gmra.mrb[20].mxu1 %vm575_vm0, %v2379_v31 }
  0x5f   : > { %2170 = vmatmul.mubr.msk.bf16.gmra.mrb[20].mxu0 %vm575_vm0, %v2380_v32  ;;  %2133 = vmatprep.mubr.msk.bf16.mxu1 %vm575_vm0, %v2381_v33 }
  0x60   : > { %2173 = vmatprep.mubr.msk.bf16.mxu0 %vm575_vm0, %v2382_v34 }
  0x66   : > { %2134 = vmatmul.mubr.msk.bf16.gmra.mrb[24].mxu1 %vm575_vm0, %v2383_v35 }
  0x67   : > { %2174 = vmatmul.mubr.msk.bf16.gmra.mrb[24].mxu0 %vm575_vm0, %v2384_v36  ;;  %2137 = vmatprep.mubr.msk.bf16.mxu1 %vm575_vm0, %v2385_v37 }
  0x68   : > { %2177 = vmatprep.mubr.msk.bf16.mxu0 %vm575_vm0, %v2386_v38 }
  0x6e   : > { %2138 = vmatmul.mubr.msk.bf16.gmra.mrb[28].mxu1 %vm575_vm0, %v2387_v39 }
  0x6f   : > { %2178 = vmatmul.mubr.msk.bf16.gmra.mrb[28].mxu0 %vm575_vm0, %v2388_v40 }
 0x109   : > { %v2111_v41 = vpop.f32.mrb[0].mxu1 }
 0x10a   : > { %v2151_v42 = vpop.f32.mrb[0].mxu0  ;;  %v658_v44 = vpop.f32.mrb[1].mxu1 }
 0x10b   : > { %v980_v45 = vadd.f32 %v2151_v42, %v2111_v41  ;;  %v971_v46 = vpop.f32.mrb[1].mxu0  ;;  %v2112_v47 = vpop.f32.mrb[2].mxu1 }
 0x10c   : > { %v972_v48 = vadd.f32 %v971_v46, %v658_v44  ;;  %v2152_v49 = vpop.f32.mrb[2].mxu0  ;;  %v661_v50 = vpop.f32.mrb[3].mxu1 }
 0x10d   : > { %v1107_v51 = vadd.f32 %v2719_v43, %v980_v45  ;;  %v983_v52 = vadd.f32 %v2152_v49, %v2112_v47  ;;  %v974_v53 = vpop.f32.mrb[3].mxu0 }
 0x10e   : > { %v1105_v54 = vadd.f32 %v2719_v43, %v972_v48  ;;  %v975_v55 = vadd.f32 %v974_v53, %v661_v50 }
 0x10f   : > { %v1108_v56 = vadd.f32 %v2719_v43, %v983_v52  ;;  %v1139_v58 = vmax.f32 %v1107_v51, 0.0 }
 0x110   : > { %v1106_v57 = vadd.f32 %v2719_v43, %v975_v55  ;;  %v1137_v61 = vmax.f32 %v1105_v54, 0.0 }
 0x111   : > { %v1140_v59 = vmax.f32 %v1108_v56, 0.0  ;;  %v2115_v60 = vpop.f32.mrb[4].mxu1 }
 0x112   : > { %v1138_v62 = vmax.f32 %v1106_v57, 0.0  ;;  %v2155_v63 = vpop.f32.mrb[4].mxu0  ;;  %v674_v0 = vpop.f32.mrb[5].mxu1 }
 0x113   : > { %v1210_v1 = vpack.c.bf16 %v1140_v59, %v1139_v58  ;;  %v996_v2 = vadd.f32 %v2155_v63, %v2115_v60  ;;  %v987_v3 = vpop.f32.mrb[5].mxu0  ;;  %v2116_v4 = vpop.f32.mrb[6].mxu1 }
 0x114   : > { %v1170_v5 = vadd.f32 %v1138_v62, %v1137_v61  ;;  %v1209_v6 = vpack.c.bf16 %v1138_v62, %v1137_v61  ;;  %v988_v7 = vadd.f32 %v987_v3, %v674_v0  ;;  %v2156_v8 = vpop.f32.mrb[6].mxu0  ;;  %v677_v9 = vpop.f32.mrb[7].mxu1 }
 0x115   : > { %1229 = vst [vmem:[%s2726_s12 + $0x8] sm:$0xff] %v1210_v1  ;;  %v1111_v10 = vadd.f32 %v2719_v43, %v996_v2  ;;  %v999_v11 = vadd.f32 %v2156_v8, %v2116_v4  ;;  %v990_v12 = vpop.f32.mrb[7].mxu0 }
 0x116   : > { %v1171_v13 = vadd.f32 %v1170_v5, %v1139_v58  ;;  %1228 = vst [vmem:[%s2726_s12] sm:$0xff] %v1209_v6  ;;  %v1109_v14 = vadd.f32 %v2719_v43, %v988_v7  ;;  %v991_v15 = vadd.f32 %v990_v12, %v677_v9 }
 0x117   : > { %v1112_v16 = vadd.f32 %v2719_v43, %v999_v11  ;;  %v1143_v20 = vmax.f32 %v1111_v10, 0.0 }
 0x118   : > { %v1141_v17 = vmax.f32 %v1109_v14, 0.0  ;;  %v1172_v18 = vadd.f32 %v1171_v13, %v1140_v59  ;;  %v1110_v19 = vadd.f32 %v2719_v43, %v991_v15 }
 0x119   : > { %v1144_v21 = vmax.f32 %v1112_v16, 0.0  ;;  %v2119_v22 = vpop.f32.mrb[8].mxu1 }
 0x11a   : > { %v1173_v23 = vadd.f32 %v1172_v18, %v1141_v17  ;;  %v1142_v24 = vmax.f32 %v1110_v19, 0.0  ;;  %v2159_v25 = vpop.f32.mrb[8].mxu0  ;;  %v690_v26 = vpop.f32.mrb[9].mxu1 }
 0x11b   : > { %v1212_v27 = vpack.c.bf16 %v1144_v21, %v1143_v20  ;;  %v1012_v28 = vadd.f32 %v2159_v25, %v2119_v22  ;;  %v1003_v29 = vpop.f32.mrb[9].mxu0  ;;  %v2120_v30 = vpop.f32.mrb[10].mxu1 }
 0x11c   : > { %v1174_v31 = vadd.f32 %v1173_v23, %v1142_v24  ;;  %v1211_v32 = vpack.c.bf16 %v1142_v24, %v1141_v17  ;;  %v1004_v33 = vadd.f32 %v1003_v29, %v690_v26  ;;  %v2160_v34 = vpop.f32.mrb[10].mxu0  ;;  %v693_v35 = vpop.f32.mrb[11].mxu1 }
 0x11d   : > { %1231 = vst [vmem:[%s2726_s12 + $0x18] sm:$0xff] %v1212_v27  ;;  %v1115_v36 = vadd.f32 %v2719_v43, %v1012_v28  ;;  %v1015_v37 = vadd.f32 %v2160_v34, %v2120_v30  ;;  %v1006_v38 = vpop.f32.mrb[11].mxu0 }
 0x11e   : > { %v1175_v39 = vadd.f32 %v1174_v31, %v1143_v20  ;;  %1230 = vst [vmem:[%s2726_s12 + $0x10] sm:$0xff] %v1211_v32  ;;  %v1113_v40 = vadd.f32 %v2719_v43, %v1004_v33  ;;  %v1007_v41 = vadd.f32 %v1006_v38, %v693_v35 }
 0x11f   : > { %v1116_v42 = vadd.f32 %v2719_v43, %v1015_v37  ;;  %v1147_v47 = vmax.f32 %v1115_v36, 0.0 }
 0x120   : > { %v1145_v44 = vmax.f32 %v1113_v40, 0.0  ;;  %v1176_v45 = vadd.f32 %v1175_v39, %v1144_v21  ;;  %v1114_v46 = vadd.f32 %v2719_v43, %v1007_v41 }
 0x121   : > { %v1148_v48 = vmax.f32 %v1116_v42, 0.0  ;;  %v2123_v49 = vpop.f32.mrb[12].mxu1 }
 0x122   : > { %v1177_v50 = vadd.f32 %v1176_v45, %v1145_v44  ;;  %v1146_v51 = vmax.f32 %v1114_v46, 0.0  ;;  %v2163_v52 = vpop.f32.mrb[12].mxu0  ;;  %v706_v53 = vpop.f32.mrb[13].mxu1 }
 0x123   : > { %v1214_v54 = vpack.c.bf16 %v1148_v48, %v1147_v47  ;;  %v1028_v55 = vadd.f32 %v2163_v52, %v2123_v49  ;;  %v1019_v56 = vpop.f32.mrb[13].mxu0  ;;  %v2124_v57 = vpop.f32.mrb[14].mxu1 }
 0x124   : > { %v1178_v58 = vadd.f32 %v1177_v50, %v1146_v51  ;;  %v1213_v59 = vpack.c.bf16 %v1146_v51, %v1145_v44  ;;  %v1020_v60 = vadd.f32 %v1019_v56, %v706_v53  ;;  %v2164_v61 = vpop.f32.mrb[14].mxu0  ;;  %v709_v62 = vpop.f32.mrb[15].mxu1 }
 0x125   : > { %1233 = vst [vmem:[%s2726_s12 + $0x28] sm:$0xff] %v1214_v54  ;;  %v1119_v63 = vadd.f32 %v2719_v43, %v1028_v55  ;;  %v1031_v0 = vadd.f32 %v2164_v61, %v2124_v57  ;;  %v1022_v1 = vpop.f32.mrb[15].mxu0 }
 0x126   : > { %v1179_v2 = vadd.f32 %v1178_v58, %v1147_v47  ;;  %1232 = vst [vmem:[%s2726_s12 + $0x20] sm:$0xff] %v1213_v59  ;;  %v1117_v3 = vadd.f32 %v2719_v43, %v1020_v60  ;;  %v1023_v4 = vadd.f32 %v1022_v1, %v709_v62 }
 0x127   : > { %v1120_v5 = vadd.f32 %v2719_v43, %v1031_v0  ;;  %v1151_v9 = vmax.f32 %v1119_v63, 0.0 }
 0x128   : > { %v1149_v6 = vmax.f32 %v1117_v3, 0.0  ;;  %v1180_v7 = vadd.f32 %v1179_v2, %v1148_v48  ;;  %v1118_v8 = vadd.f32 %v2719_v43, %v1023_v4 }
 0x129   : > { %v1152_v10 = vmax.f32 %v1120_v5, 0.0  ;;  %v2127_v11 = vpop.f32.mrb[16].mxu1 }
 0x12a   : > { %v1181_v12 = vadd.f32 %v1180_v7, %v1149_v6  ;;  %v1150_v13 = vmax.f32 %v1118_v8, 0.0  ;;  %v2167_v14 = vpop.f32.mrb[16].mxu0  ;;  %v722_v15 = vpop.f32.mrb[17].mxu1 }
 0x12b   : > { %v1216_v16 = vpack.c.bf16 %v1152_v10, %v1151_v9  ;;  %v1044_v17 = vadd.f32 %v2167_v14, %v2127_v11  ;;  %v1035_v18 = vpop.f32.mrb[17].mxu0  ;;  %v2128_v19 = vpop.f32.mrb[18].mxu1 }
 0x12c   : > { %v1182_v20 = vadd.f32 %v1181_v12, %v1150_v13  ;;  %v1215_v21 = vpack.c.bf16 %v1150_v13, %v1149_v6  ;;  %v1036_v22 = vadd.f32 %v1035_v18, %v722_v15  ;;  %v2168_v23 = vpop.f32.mrb[18].mxu0  ;;  %v725_v24 = vpop.f32.mrb[19].mxu1 }
 0x12d   : > { %1235 = vst [vmem:[%s2726_s12 + $0x38] sm:$0xff] %v1216_v16  ;;  %v1123_v25 = vadd.f32 %v2719_v43, %v1044_v17  ;;  %v1047_v26 = vadd.f32 %v2168_v23, %v2128_v19  ;;  %v1038_v27 = vpop.f32.mrb[19].mxu0 }
 0x12e   : > { %v1183_v28 = vadd.f32 %v1182_v20, %v1151_v9  ;;  %1234 = vst [vmem:[%s2726_s12 + $0x30] sm:$0xff] %v1215_v21  ;;  %v1121_v29 = vadd.f32 %v2719_v43, %v1036_v22  ;;  %v1039_v30 = vadd.f32 %v1038_v27, %v725_v24 }
 0x12f   : > { %v1124_v31 = vadd.f32 %v2719_v43, %v1047_v26  ;;  %v1155_v35 = vmax.f32 %v1123_v25, 0.0 }
 0x130   : > { %v1153_v32 = vmax.f32 %v1121_v29, 0.0  ;;  %v1184_v33 = vadd.f32 %v1183_v28, %v1152_v10  ;;  %v1122_v34 = vadd.f32 %v2719_v43, %v1039_v30 }
 0x131   : > { %v1156_v36 = vmax.f32 %v1124_v31, 0.0  ;;  %v2131_v37 = vpop.f32.mrb[20].mxu1 }
 0x132   : > { %v1185_v38 = vadd.f32 %v1184_v33, %v1153_v32  ;;  %v1154_v39 = vmax.f32 %v1122_v34, 0.0  ;;  %v2171_v40 = vpop.f32.mrb[20].mxu0  ;;  %v738_v41 = vpop.f32.mrb[21].mxu1 }
 0x133   : > { %v1218_v42 = vpack.c.bf16 %v1156_v36, %v1155_v35  ;;  %v1060_v44 = vadd.f32 %v2171_v40, %v2131_v37  ;;  %v1051_v45 = vpop.f32.mrb[21].mxu0  ;;  %v2132_v46 = vpop.f32.mrb[22].mxu1 }
 0x134   : > { %v1186_v47 = vadd.f32 %v1185_v38, %v1154_v39  ;;  %v1217_v48 = vpack.c.bf16 %v1154_v39, %v1153_v32  ;;  %v1052_v49 = vadd.f32 %v1051_v45, %v738_v41  ;;  %v2172_v50 = vpop.f32.mrb[22].mxu0  ;;  %v741_v51 = vpop.f32.mrb[23].mxu1 }
 0x135   : > { %1237 = vst [vmem:[%s2726_s12 + $0x48] sm:$0xff] %v1218_v42  ;;  %v1127_v52 = vadd.f32 %v2719_v43, %v1060_v44  ;;  %v1063_v53 = vadd.f32 %v2172_v50, %v2132_v46  ;;  %v1054_v54 = vpop.f32.mrb[23].mxu0 }
 0x136   : > { %v1187_v55 = vadd.f32 %v1186_v47, %v1155_v35  ;;  %1236 = vst [vmem:[%s2726_s12 + $0x40] sm:$0xff] %v1217_v48  ;;  %v1125_v56 = vadd.f32 %v2719_v43, %v1052_v49  ;;  %v1055_v57 = vadd.f32 %v1054_v54, %v741_v51 }
 0x137   : > { %v1128_v58 = vadd.f32 %v2719_v43, %v1063_v53  ;;  %v1159_v62 = vmax.f32 %v1127_v52, 0.0 }
 0x138   : > { %v1157_v59 = vmax.f32 %v1125_v56, 0.0  ;;  %v1188_v60 = vadd.f32 %v1187_v55, %v1156_v36  ;;  %v1126_v61 = vadd.f32 %v2719_v43, %v1055_v57 }
 0x139   : > { %v1160_v63 = vmax.f32 %v1128_v58, 0.0  ;;  %v2135_v0 = vpop.f32.mrb[24].mxu1 }
 0x13a   : > { %v1189_v1 = vadd.f32 %v1188_v60, %v1157_v59  ;;  %v1158_v2 = vmax.f32 %v1126_v61, 0.0  ;;  %v2175_v3 = vpop.f32.mrb[24].mxu0  ;;  %v754_v4 = vpop.f32.mrb[25].mxu1 }
 0x13b   : > { %v1220_v5 = vpack.c.bf16 %v1160_v63, %v1159_v62  ;;  %v1076_v6 = vadd.f32 %v2175_v3, %v2135_v0  ;;  %v1067_v7 = vpop.f32.mrb[25].mxu0  ;;  %v2136_v8 = vpop.f32.mrb[26].mxu1 }
 0x13c   : > { %v1190_v9 = vadd.f32 %v1189_v1, %v1158_v2  ;;  %v1219_v10 = vpack.c.bf16 %v1158_v2, %v1157_v59  ;;  %v1068_v11 = vadd.f32 %v1067_v7, %v754_v4  ;;  %v2176_v12 = vpop.f32.mrb[26].mxu0  ;;  %v757_v13 = vpop.f32.mrb[27].mxu1  ;;  %v1169_v1 = vld [vmem:[#allocation3] sm:$0x1] }
 0x13d   : > { %1239 = vst [vmem:[%s2726_s12 + $0x58] sm:$0xff] %v1220_v5  ;;  %v1131_v14 = vadd.f32 %v2719_v43, %v1076_v6  ;;  %v1079_v15 = vadd.f32 %v2176_v12, %v2136_v8  ;;  %v1070_v16 = vpop.f32.mrb[27].mxu0 }
 0x13e   : > { %v1191_v17 = vadd.f32 %v1190_v9, %v1159_v62  ;;  %1238 = vst [vmem:[%s2726_s12 + $0x50] sm:$0xff] %v1219_v10  ;;  %v1129_v18 = vadd.f32 %v2719_v43, %v1068_v11  ;;  %v1071_v19 = vadd.f32 %v1070_v16, %v757_v13 }
 0x13f   : > { %v1132_v20 = vadd.f32 %v2719_v43, %v1079_v15  ;;  %v1163_v24 = vmax.f32 %v1131_v14, 0.0 }
 0x140   : > { %v1161_v21 = vmax.f32 %v1129_v18, 0.0  ;;  %v1192_v22 = vadd.f32 %v1191_v17, %v1160_v63  ;;  %v1130_v23 = vadd.f32 %v2719_v43, %v1071_v19 }
 0x141   : > { %v1164_v25 = vmax.f32 %v1132_v20, 0.0  ;;  %v2139_v26 = vpop.f32.mrb[28].mxu1 }
 0x142   : > { %v1193_v27 = vadd.f32 %v1192_v22, %v1161_v21  ;;  %v1162_v28 = vmax.f32 %v1130_v23, 0.0  ;;  %v2179_v29 = vpop.f32.mrb[28].mxu0  ;;  %v770_v30 = vpop.f32.mrb[29].mxu1 }
 0x143   : > { %v1222_v31 = vpack.c.bf16 %v1164_v25, %v1163_v24  ;;  %v1092_v32 = vadd.f32 %v2179_v29, %v2139_v26  ;;  %v1083_v33 = vpop.f32.mrb[29].mxu0  ;;  %v2140_v34 = vpop.f32.mrb[30].mxu1 }
 0x144   : > { %v1194_v35 = vadd.f32 %v1193_v27, %v1162_v28  ;;  %v1221_v36 = vpack.c.bf16 %v1162_v28, %v1161_v21  ;;  %v1084_v37 = vadd.f32 %v1083_v33, %v770_v30  ;;  %v2180_v38 = vpop.f32.mrb[30].mxu0  ;;  %v773_v39 = vpop.f32.mrb[31].mxu1 }
 0x145   : > { %1241 = vst [vmem:[%s2726_s12 + $0x68] sm:$0xff] %v1222_v31  ;;  %v1135_v40 = vadd.f32 %v2719_v43, %v1092_v32  ;;  %v1095_v41 = vadd.f32 %v2180_v38, %v2140_v34  ;;  %v1086_v42 = vpop.f32.mrb[31].mxu0 }
 0x146   : > { %v1195_v44 = vadd.f32 %v1194_v35, %v1163_v24  ;;  %1240 = vst [vmem:[%s2726_s12 + $0x60] sm:$0xff] %v1221_v36  ;;  %v1133_v45 = vadd.f32 %v2719_v43, %v1084_v37  ;;  %v1087_v46 = vadd.f32 %v1086_v42, %v773_v39 }
 0x147   : > { %v1136_v47 = vadd.f32 %v2719_v43, %v1095_v41  ;;  %v1167_v51 = vmax.f32 %v1135_v40, 0.0 }
 0x148   : > { %v1165_v48 = vmax.f32 %v1133_v45, 0.0  ;;  %v1196_v49 = vadd.f32 %v1195_v44, %v1164_v25  ;;  %v1134_v50 = vadd.f32 %v2719_v43, %v1087_v46 }
 0x149   : > { %v1168_v52 = vmax.f32 %v1136_v47, 0.0 }
 0x14a   : > { %v1197_v53 = vadd.f32 %v1196_v49, %v1165_v48  ;;  %v1166_v54 = vmax.f32 %v1134_v50, 0.0 }
 0x14b   : > { %v1224_v55 = vpack.c.bf16 %v1168_v52, %v1167_v51 }
 0x14c   : > { %v1198_v56 = vadd.f32 %v1197_v53, %v1166_v54  ;;  %v1223_v57 = vpack.c.bf16 %v1166_v54, %v1165_v48 }
 0x14d   : > { %1243 = vst [vmem:[%s2726_s12 + $0x78] sm:$0xff] %v1224_v55 }
 0x14e   : > { %v1199_v58 = vadd.f32 %v1198_v56, %v1167_v51  ;;  %1242 = vst [vmem:[%s2726_s12 + $0x70] sm:$0xff] %v1223_v57 }
 0x150   : > { %v1200_v59 = vadd.f32 %v1199_v58, %v1168_v52 }
 0x152   : > { %v1201_v60 = vrot.slane %v1200_v59, 4 }
 0x154   : > { %v1202_v61 = vadd.f32 %v1201_v60, %v1200_v59 }
 0x156   : > { %v1203_v62 = vrot.slane %v1202_v61, 2 }
 0x158   : > { %v1204_v63 = vadd.f32 %v1203_v62, %v1202_v61 }
 0x15a   : > { %v1205_v0 = vrot.slane %v1204_v63, 1 }
 0x15c   : > { %v1206_v2 = vadd.f32 %v1205_v0, %v1204_v63 }
 0x15e   : > { %v1207_v3 = vadd.f32 %v1206_v2, %v1169_v1 }
 0x160   : > { %1208 = vst [vmem:[#allocation3] sm:$0x1] %v1207_v3 }
 0x161 PF: > { %1246 = sbr.rel (%p1753_p1) target bundleno = 631 (0x277), region = 60  ;;  %v1911_v43 = vld [vmem:[%s2940_s5] sm:$0xff] (!%p1753_p1)   ;;  %v2490_v4 = vmov (!%p1753_p1), 0.0|0.0   ;;  %vm2491_vm1 = vmmov (!%p1753_p1), 0   ;;  %v2492_v5 = vmov (!%p1753_p1), 0.0   ;;  %v2022_v6 = vld [vmem:[%s2940_s5 + $0x8] sm:$0xff] (!%p1753_p1)  }
 0x162   : > { %2216 = vmatprep.subr.bf16.mxu0 (!%p1753_p1), %v2490_v4  ;;  %2213 = vmatprep.mubr.msk.f32.mxu0 (!%p1753_p1), %vm2491_vm1, %v2492_v5  ;;  %v2023_v7 = vld [vmem:[%s2940_s5 + $0x10] sm:$0xff] (!%p1753_p1)   ;;  %v2024_v8 = vld [vmem:[%s2940_s5 + $0x18] sm:$0xff] (!%p1753_p1)   ;;  %v2025_v9 = vld [vmem:[%s2940_s5 + $0x20] sm:$0xff] (!%p1753_p1)  }
 0x163   : > { %2218 = vmatpush3.bf16.msra.mxu0 (!%p1753_p1), %v1911_v43  ;;  %v2026_v10 = vld [vmem:[%s2940_s5 + $0x28] sm:$0xff] (!%p1753_p1)   ;;  %v2027_v11 = vld [vmem:[%s2940_s5 + $0x30] sm:$0xff] (!%p1753_p1)   ;;  %v2028_v13 = vld [vmem:[%s2940_s5 + $0x38] sm:$0xff] (!%p1753_p1)  }
 0x164   : > { %2219 = vmatprep.subr.bf16.mxu0 (!%p1753_p1), %v2490_v4  ;;  %v1281_v15 = vld [vmem:[%s2941_s6] sm:$0x1] (!%p1753_p1) }
 0x167   : > { %2221 = vmatpush3.bf16.msra.mxu0 (!%p1753_p1), %v2022_v6  ;;  %v1247_v12 = vld [vmem:[#allocation3] sm:$0x1] (!%p1753_p1) }
 0x168   : > { %2222 = vmatprep.subr.bf16.mxu0 %v2490_v4  ;;  %v1248_v14 = vmul.f32 0.00390625, %v1247_v12 }
 0x16b   : > { %2224 = vmatpush3.bf16.msra.mxu0 %v2023_v7 }
 0x16c   : > { %2225 = vmatprep.subr.bf16.mxu0 %v2490_v4 }
 0x16f   : > { %2227 = vmatpush3.bf16.msra.mxu0 %v2024_v8 }
 0x170   : > { %2228 = vmatprep.subr.bf16.mxu0 %v2490_v4 }
 0x173   : > { %2230 = vmatpush3.bf16.msra.mxu0 %v2025_v9 }
 0x174   : > { %2231 = vmatprep.subr.bf16.mxu0 %v2490_v4 }
 0x177   : > { %2233 = vmatpush3.bf16.msra.mxu0 %v2026_v10 }
 0x178   : > { %2234 = vmatprep.subr.bf16.mxu0 %v2490_v4 }
 0x17b   : > { %2236 = vmatpush3.bf16.msra.mxu0 %v2027_v11 }
 0x17c   : > { %2237 = vmatprep.subr.bf16.mxu0 %v2490_v4 }
 0x17f   : > { %2239 = vmatpush3.bf16.msra.mxu0 %v2028_v13 }
 0x182   : > { %2214 = vmatmul.mubr.f32.vlgmr.msra.gmra.mrb[0].mxu0 %v1248_v14 }
 0x255   : > { %v1348_v16 = vpop.f32.mrb[0].mxu0 }
 0x256   : > { %v1349_v17 = vadd.f32 %v1348_v16, %v1281_v15  ;;  %v2215_v18 = vpop.f32.mrb[1].mxu0 }
 0x258   : > { %v1352_v19 = vmax.f32 %v1349_v17, 0.0 }
 0x25a   : > { %v1831_v20 = vmul.f32 -1.442695, %v1352_v19 }
 0x25c   : > { %2389 = vpow2.f32 %v1831_v20 }
 0x266   : > { %v2390_v21 = vpop.eup %2389 }
 0x267   : > { %v1356_v22 = vadd.f32 1.0, %v2390_v21 }
 0x269   : > { %2391 = vrcp.f32 %v1356_v22 }
 0x273   : > { %v2392_v23 = vpop.eup %2391 }
 0x274   : > { %v1359_v24 = vadd.f32 1.0, %v2392_v23 }
 0x276   : > { %1360 = vst [vmem:[#allocation4] sm:$0x1] %v1359_v24 }
 0x277 PF: > { %p1832_p3 = scmp.lt.s32.totalorder %s2471_s27, 1 }
 0x278   : > { %s1833_s21 = sadd.s32 (!%p1832_p3), 4294967295, %s2471_s27 }
 0x279   : > { %1364 = sbr.rel (%p1832_p3) target bundleno = 660 (0x294), region = 64  ;;  %s1877_s30 = sshll.u32 (!%p1832_p3), %s1833_s21, 7 }
 0x27a   : > { %s2805_s11 = scalar_lea.vmem (!%p1832_p3), [#allocation2], %s1877_s30 }
 0x27b   : > { %v1369_v26 = vld [vmem:[%s2805_s11] sm:$0xff] (!%p1832_p3)  ;;  %v1370_v27 = vld [vmem:[%s2805_s11 + $0x8] sm:$0xff] (!%p1832_p3)  ;;  %v1371_v28 = vld [vmem:[%s2805_s11 + $0x10] sm:$0xff] (!%p1832_p3) }
 0x27c   : > { %v1385_v29 = vunpack.c.l.bf16 (!%p1832_p3), %v1369_v26  ;;  %v1386_v30 = vunpack.c.h.bf16 (!%p1832_p3), %v1369_v26  ;;  %v1387_v31 = vunpack.c.l.bf16 (!%p1832_p3), %v1370_v27  ;;  %v1388_v32 = vunpack.c.h.bf16 (!%p1832_p3), %v1370_v27  ;;  %v1372_v33 = vld [vmem:[%s2805_s11 + $0x18] sm:$0xff] (!%p1832_p3)  ;;  %v1373_v38 = vld [vmem:[%s2805_s11 + $0x20] sm:$0xff] (!%p1832_p3)  ;;  %v1374_v44 = vld [vmem:[%s2805_s11 + $0x28] sm:$0xff] (!%p1832_p3) }
 0x27d   : > { %v2803_v25 = vld [vmem:[#allocation4] ss:$0 sm:$0xff] (!%p1832_p3)  ;;  %v1389_v34 = vunpack.c.l.bf16 (!%p1832_p3), %v1371_v28  ;;  %v1390_v35 = vunpack.c.h.bf16 (!%p1832_p3), %v1371_v28  ;;  %v1391_v36 = vunpack.c.l.bf16 (!%p1832_p3), %v1372_v33  ;;  %v1392_v37 = vunpack.c.h.bf16 (!%p1832_p3), %v1372_v33  ;;  %v1375_v49 = vld [vmem:[%s2805_s11 + $0x30] sm:$0xff] (!%p1832_p3)  ;;  %v1376_v54 = vld [vmem:[%s2805_s11 + $0x38] sm:$0xff] (!%p1832_p3) }
 0x27e   : > { %v1424_v39 = vmul.f32 (!%p1832_p3), %v2803_v25, %v1385_v29  ;;  %v1425_v40 = vmul.f32 (!%p1832_p3), %v2803_v25, %v1386_v30  ;;  %v1426_v41 = vmul.f32 (!%p1832_p3), %v2803_v25, %v1387_v31  ;;  %v1427_v42 = vmul.f32 (!%p1832_p3), %v2803_v25, %v1388_v32  ;;  %v1377_v59 = vld [vmem:[%s2805_s11 + $0x40] sm:$0xff] (!%p1832_p3)  ;;  %v1378_v43 = vld [vmem:[%s2805_s11 + $0x48] sm:$0xff] (!%p1832_p3)  ;;  %v1379_v8 = vld [vmem:[%s2805_s11 + $0x50] sm:$0xff] (!%p1832_p3) }
 0x27f   : > { %v1428_v45 = vmul.f32 (!%p1832_p3), %v2803_v25, %v1389_v34  ;;  %v1429_v46 = vmul.f32 (!%p1832_p3), %v2803_v25, %v1390_v35  ;;  %v1430_v47 = vmul.f32 (!%p1832_p3), %v2803_v25, %v1391_v36  ;;  %v1431_v48 = vmul.f32 (!%p1832_p3), %v2803_v25, %v1392_v37  ;;  %v1380_v13 = vld [vmem:[%s2805_s11 + $0x58] sm:$0xff] (!%p1832_p3)  ;;  %v1381_v18 = vld [vmem:[%s2805_s11 + $0x60] sm:$0xff] (!%p1832_p3)  ;;  %v1382_v28 = vld [vmem:[%s2805_s11 + $0x68] sm:$0xff] (!%p1832_p3) }
 0x280   : > { %v1945_v50 = vpack.c.bf16 %v1425_v40, %v1424_v39  ;;  %v1950_v51 = vpack.c.bf16 %v1427_v42, %v1426_v41  ;;  %v1393_v52 = vunpack.c.l.bf16 %v1373_v38  ;;  %v1394_v53 = vunpack.c.h.bf16 %v1373_v38  ;;  %v1383_v33 = vld [vmem:[%s2805_s11 + $0x70] sm:$0xff]  ;;  %v1384_v38 = vld [vmem:[%s2805_s11 + $0x78] sm:$0xff] }
 0x281   : > { %v1955_v55 = vpack.c.bf16 %v1429_v46, %v1428_v45  ;;  %v1960_v56 = vpack.c.bf16 %v1431_v48, %v1430_v47  ;;  %v1395_v57 = vunpack.c.l.bf16 %v1374_v44  ;;  %v1396_v58 = vunpack.c.h.bf16 %v1374_v44 }
 0x282   : > { %1946 = vst [vmem:[%s2622_s18] sm:$0xff] %v1945_v50   ;;  %2029 = vst [vmem:[%s2622_s18 + $0x8] sm:$0xff] %v1950_v51   ;;  %v1432_v60 = vmul.f32 %v2803_v25, %v1393_v52  ;;  %v1433_v61 = vmul.f32 %v2803_v25, %v1394_v53  ;;  %v1397_v62 = vunpack.c.l.bf16 %v1375_v49  ;;  %v1398_v63 = vunpack.c.h.bf16 %v1375_v49 }
 0x283   : > { %2030 = vst [vmem:[%s2622_s18 + $0x10] sm:$0xff] %v1955_v55   ;;  %2031 = vst [vmem:[%s2622_s18 + $0x18] sm:$0xff] %v1960_v56   ;;  %v1434_v0 = vmul.f32 %v2803_v25, %v1395_v57  ;;  %v1435_v1 = vmul.f32 %v2803_v25, %v1396_v58  ;;  %v1399_v2 = vunpack.c.l.bf16 %v1376_v54  ;;  %v1400_v3 = vunpack.c.h.bf16 %v1376_v54 }
 0x284   : > { %v1965_v4 = vpack.c.bf16 %v1433_v61, %v1432_v60  ;;  %v1436_v5 = vmul.f32 %v2803_v25, %v1397_v62  ;;  %v1437_v6 = vmul.f32 %v2803_v25, %v1398_v63  ;;  %v1401_v7 = vunpack.c.l.bf16 %v1377_v59 }
 0x285   : > { %v1970_v9 = vpack.c.bf16 %v1435_v1, %v1434_v0  ;;  %v1438_v10 = vmul.f32 %v2803_v25, %v1399_v2  ;;  %v1439_v11 = vmul.f32 %v2803_v25, %v1400_v3  ;;  %v1402_v12 = vunpack.c.h.bf16 %v1377_v59 }
 0x286   : > { %2032 = vst [vmem:[%s2622_s18 + $0x20] sm:$0xff] %v1965_v4   ;;  %v1975_v14 = vpack.c.bf16 %v1437_v6, %v1436_v5  ;;  %v1440_v15 = vmul.f32 %v2803_v25, %v1401_v7  ;;  %v1403_v16 = vunpack.c.l.bf16 %v1378_v43  ;;  %v1404_v17 = vunpack.c.h.bf16 %v1378_v43 }
 0x287   : > { %2033 = vst [vmem:[%s2622_s18 + $0x28] sm:$0xff] %v1970_v9   ;;  %v1980_v19 = vpack.c.bf16 %v1439_v11, %v1438_v10  ;;  %v1441_v20 = vmul.f32 %v2803_v25, %v1402_v12  ;;  %v1405_v21 = vunpack.c.l.bf16 %v1379_v8  ;;  %v1406_v22 = vunpack.c.h.bf16 %v1379_v8 }
 0x288   : > { %2034 = vst [vmem:[%s2622_s18 + $0x30] sm:$0xff] %v1975_v14   ;;  %v1442_v23 = vmul.f32 %v2803_v25, %v1403_v16  ;;  %v1443_v24 = vmul.f32 %v2803_v25, %v1404_v17  ;;  %v1407_v26 = vunpack.c.l.bf16 %v1380_v13  ;;  %v1408_v27 = vunpack.c.h.bf16 %v1380_v13 }
 0x289   : > { %2035 = vst [vmem:[%s2622_s18 + $0x38] sm:$0xff] %v1980_v19   ;;  %v1985_v29 = vpack.c.bf16 %v1441_v20, %v1440_v15  ;;  %v1444_v30 = vmul.f32 %v2803_v25, %v1405_v21  ;;  %v1445_v31 = vmul.f32 %v2803_v25, %v1406_v22  ;;  %v1409_v32 = vunpack.c.l.bf16 %v1381_v18 }
 0x28a   : > { %v1990_v34 = vpack.c.bf16 %v1443_v24, %v1442_v23  ;;  %v1446_v35 = vmul.f32 %v2803_v25, %v1407_v26  ;;  %v1447_v36 = vmul.f32 %v2803_v25, %v1408_v27  ;;  %v1410_v37 = vunpack.c.h.bf16 %v1381_v18 }
 0x28b   : > { %2036 = vst [vmem:[%s2622_s18 + $0x40] sm:$0xff] %v1985_v29   ;;  %v1995_v39 = vpack.c.bf16 %v1445_v31, %v1444_v30  ;;  %v1448_v40 = vmul.f32 %v2803_v25, %v1409_v32  ;;  %v1411_v41 = vunpack.c.l.bf16 %v1382_v28  ;;  %v1412_v42 = vunpack.c.h.bf16 %v1382_v28 }
 0x28c   : > { %2037 = vst [vmem:[%s2622_s18 + $0x48] sm:$0xff] %v1990_v34   ;;  %v2000_v44 = vpack.c.bf16 %v1447_v36, %v1446_v35  ;;  %v1449_v45 = vmul.f32 %v2803_v25, %v1410_v37  ;;  %v1413_v46 = vunpack.c.l.bf16 %v1383_v33  ;;  %v1414_v47 = vunpack.c.h.bf16 %v1383_v33 }
 0x28d   : > { %2038 = vst [vmem:[%s2622_s18 + $0x50] sm:$0xff] %v1995_v39   ;;  %v1450_v48 = vmul.f32 %v2803_v25, %v1411_v41  ;;  %v1451_v49 = vmul.f32 %v2803_v25, %v1412_v42  ;;  %v1415_v50 = vunpack.c.l.bf16 %v1384_v38  ;;  %v1416_v51 = vunpack.c.h.bf16 %v1384_v38 }
 0x28e   : > { %2039 = vst [vmem:[%s2622_s18 + $0x58] sm:$0xff] %v2000_v44   ;;  %v2005_v52 = vpack.c.bf16 %v1449_v45, %v1448_v40  ;;  %v1452_v53 = vmul.f32 %v2803_v25, %v1413_v46  ;;  %v1453_v54 = vmul.f32 %v2803_v25, %v1414_v47 }
 0x28f   : > { %v2010_v55 = vpack.c.bf16 %v1451_v49, %v1450_v48  ;;  %v1454_v56 = vmul.f32 %v2803_v25, %v1415_v50  ;;  %v1455_v57 = vmul.f32 %v2803_v25, %v1416_v51 }
 0x290   : > { %2040 = vst [vmem:[%s2622_s18 + $0x60] sm:$0xff] %v2005_v52   ;;  %v2015_v58 = vpack.c.bf16 %v1453_v54, %v1452_v53 }
 0x291   : > { %2041 = vst [vmem:[%s2622_s18 + $0x68] sm:$0xff] %v2010_v55   ;;  %v2020_v59 = vpack.c.bf16 %v1455_v57, %v1454_v56 }
 0x292   : > { %2042 = vst [vmem:[%s2622_s18 + $0x70] sm:$0xff] %v2015_v58  }
 0x293   : > { %2043 = vst [vmem:[%s2622_s18 + $0x78] sm:$0xff] %v2020_v59  }
 0x294 PF: > { %s1870_s19 = sadd.s32 4294967295, %s2471_s27  ;;  %s1872_s22 = sshll.u32 %s2475_s28, 5 }
 0x295   : > { %p1625_p4 = scmp.gt.s32.totalorder %s1870_s19, 0  ;;  %s1635_s23 = sshll.u32 %s2622_s18, 4  ;;  %s2874_s23 = int_to_ptr.vmem [resolvable:$true] %s1635_s23 }
 0x296   : > { %s2953_s20 = sand.u32 1, %s2463_s25   ;;  %s2393_s27 = scalar_lea.vmem %s2874_s23, 2048 }
 0x297   : > { %s2970_s19 = smov (!%p1625_p4, %s1870_s19), 0  ;;  %s2883_s21 = scalar_lea.sflag [#allocation6], %s2953_s20 }
 0x298   : > { %s1871_s29 = sshll.u32 %s2970_s19, 5  ;;  %p2394_p6 = scmp.ne.s32.totalorder %s2874_s23, %s2393_s27 }
 0x299   : > { %s1632_s12 = sadd.s32 %s1872_s22, %s1871_s29  ;;  %s2493_s28 = smov [#allocation5]  }
 0x29a   : > { %s1873_s9 = sshll.u32 %s1632_s12, 6  ;;  %p2395_p7 = pnand %p2394_p6, %p2592_p5 }
 0x29b   : > { %s2879_s14 = scalar_lea.hbm %s2942_s7, %s1873_s9  ;;  %s2397_s18 = sshll.u32 %s2493_s28, 4  ;;  %s2398_s18 = int_to_ptr.vmem [resolvable:$false] %s2397_s18 }
 0x29c   : > { %p2396_p8 = pneg %p2395_p7  ;;  %s2399_s30 = scalar_lea.vmem %s2398_s18, 4096 }
 0x29d   : > { %p2400_p9 = scmp.lt.s32.totalorder %s2874_s23, %s2398_s18  ;;  %p2401_p11 = scmp.lt.s32.totalorder %s2399_s30, %s2393_s27 }
 0x29f   : > { %p2402_p12 = por %p2401_p11, %p2400_p9 }
 0x2a1   : > { %p2403_p13 = pnand %p2402_p12, %p2396_p8 }
 0x2a3   : > { %2406 = shalt.err (!%p2403_p13)
}
 0x2a4   : > { %s2407_s11 = scalar_lea.hbm %s2879_s14, 2048  ;;  %s2411_s29 = scalar_lea.hbm %s2942_s7, 4096 }
 0x2a5   : > { %p2408_p0 = scmp.ne.s32.totalorder %s2879_s14, %s2407_s11  ;;  %p2412_p3 = scmp.lt.u32.totalorder %s2879_s14, %s2942_s7 }
 0x2a6   : > { %p2413_p4 = scmp.lt.u32.totalorder %s2411_s29, %s2407_s11  ;;  %p2415_p7 = scmp.lt.u32.totalorder %s2407_s11, %s2879_s14 }
 0x2a7   : > { %p2409_p1 = pnand %p2408_p0, %p2592_p5 }
 0x2a8   : > { %p2414_p6 = por %p2413_p4, %p2412_p3 }
 0x2a9   : > { %p2410_p2 = pneg %p2409_p1 }
 0x2aa   : > { %p2416_p8 = por %p2415_p7, %p2414_p6 }
 0x2ac   : > { %p2417_p9 = pnand %p2416_p8, %p2410_p2 }
 0x2ae   : > { %2420 = shalt.err (!%p2417_p9)
}
 0x2af   : > { %s2494_s10 = smov 64   ;;  %s2495_s13 = smov 4  }
 0x2b0   : > { %2272 = dma.vmem_to_hbm [thread:$0]  (%p2592_p5), %s2874_s23, 2048, %s2879_s14, %s2883_s21, %s2494_s10, %s2494_s10, %s2495_s13  }
 0x2b1 PF: > { %p2278_p11 = scmp.ge.s32.totalorder %s2487_s8, 2  ;;  %s1650_s20 = sand.u32 1, %s2459_s24  }
 0x2b2   : > { %s1651_s27 = scalar_lea.sflag [#allocation6], %s1650_s20 }
 0x2b3   : > { %p2275_p12 = pnand %p2278_p11, %p2601_p10 }
 0x2b5   : > { %2454 = dma.done.wait (!%p2275_p12), %s1651_s27, 2048  }
 0x2b6   : > { %2456 = vsyncadd (!%p2275_p12), %s1651_s27, 4294965248  ;;  %s20_s8 = sadd.s32 1, %s2487_s8   ;;  %s2954_s27 = sld [smem:[#allocation8_spill]] }
 0x2b7   : > { %p17_p13 = scmp.ge.s32.totalorder %s20_s8, 6   ;;  %s2955_s28 = sld [smem:[#allocation9_spill]] }
 0x2b8   : > { %s2956_s29 = sld [smem:[#allocation10_spill]]  ;;  %s2957_s30 = sld [smem:[#allocation11_spill]] }
 0x2b9   : > { %s2958_s24 = smov %s2463_s25  ;;  %s2959_s25 = smov %s2467_s26 }
 0x2ba   : > { %s2960_s26 = smov %s2599_s16  ;;  %19 = sbr.rel (!%p17_p13) target bundleno = 5 (0x5), region = 104 }
 0x2c1   :  { %1656 = vsyncpa [#allocation6], 1 }
 0x2c2   :  { %1658 = vsyncpa [#allocation6 + $0x1], 1 }

</bundles_post_ra>
